<compile_context>
chip_gen: v7x
topology: tpu7x:2x2x1
jax: 0.10.0
libtpu: 0.0.40
codegen_flags: <defaults>
</compile_context>

<pallas_src>
import jax
import jax.numpy as jnp
from jax.experimental import pallas as pl
from jax.experimental.pallas import tpu as pltpu


def fixed_gaussian_kernel(std_ref, mean_ref, std_out_ref):
    # std_ref: (1,) f32 in SMEM; mean_ref / std_out_ref: (TM, output_dim) VMEM tiles.
    mean_ref[...] = jnp.zeros_like(mean_ref)
    s = std_ref[0].astype(std_out_ref.dtype)
    std_out_ref[...] = jnp.broadcast_to(s, std_out_ref.shape)


def _choose_batch_tile(batch, output_dim, dtype_bytes=4, max_tile=1024,
                       vmem_budget_bytes=8 * 1024 * 1024):
    """Largest batch tile (multiple of 8, capped) whose double-buffered outputs fit VMEM."""
    if batch <= max_tile:
        return batch  # single block == full array dim (always legal)
    tile = max_tile
    # 2 outputs x 2 pipeline buffers per tile.
    while tile > 8 and 2 * 2 * tile * output_dim * dtype_bytes > vmem_budget_bytes:
        tile //= 2
    return max(8, (tile // 8) * 8)


def fixed_gaussian_forward(x, output_dim, std, dtype=jnp.float32):
    """Returns (mean, std) with shape (x.shape[0], output_dim), matching the PyTorch module."""
    batch = x.shape[0]
    tm = _choose_batch_tile(batch, output_dim)
    grid = (pl.cdiv(batch, tm),)

    std_arr = jnp.asarray([std], dtype=jnp.float32)  # (1,) scalar, lives in SMEM

    out_bytes = 2 * batch * output_dim * jnp.dtype(dtype).itemsize
    cost = pl.CostEstimate(flops=0, transcendentals=0, bytes_accessed=out_bytes + 4)

    mean, std_out = pl.pallas_call(
        fixed_gaussian_kernel,
        out_shape=(
            jax.ShapeDtypeStruct((batch, output_dim), dtype),
            jax.ShapeDtypeStruct((batch, output_dim), dtype),
        ),
        grid=grid,
        in_specs=[pl.BlockSpec(memory_space=pltpu.MemorySpace.SMEM)],
        out_specs=(
            pl.BlockSpec((tm, output_dim), lambda i: (i, 0)),
            pl.BlockSpec((tm, output_dim), lambda i: (i, 0)),
        ),
        compiler_params=pltpu.CompilerParams(dimension_semantics=("parallel",)),
        cost_estimate=cost,
    )(std_arr)
    return mean, std_out


def _reference_forward(x, output_dim, std):
    batch = x.shape[0]
    return (jnp.zeros((batch, output_dim), jnp.float32),
            jnp.full((batch, output_dim), std, jnp.float32))


if __name__ == "__main__":
    # Small shapes consistent with the module: x is [batch, feature]; only batch matters.
    B, X_DIM, OUTPUT_DIM, STD = 8, 32, 6, 0.5

    key = jax.random.PRNGKey(0)
    x = jax.random.normal(key, (B, X_DIM), jnp.float32)

    mean, std = fixed_gaussian_forward(x, OUTPUT_DIM, STD)
    mean, std = jax.block_until_ready((mean, std))

    mean_ref, std_ref = _reference_forward(x, OUTPUT_DIM, STD)
    assert mean.shape == (B, OUTPUT_DIM) and std.shape == (B, OUTPUT_DIM)
    assert jnp.array_equal(mean, mean_ref)
    assert jnp.allclose(std, std_ref)

    # Exercise the tiled multi-block path (grid > 1, non-divisible batch -> partial last tile).
    B2 = 4100
    x2 = jnp.zeros((B2, X_DIM), jnp.float32)
    mean2, std2 = jax.block_until_ready(fixed_gaussian_forward(x2, OUTPUT_DIM, STD))
    assert mean2.shape == (B2, OUTPUT_DIM) and std2.shape == (B2, OUTPUT_DIM)
    assert bool(jnp.all(mean2 == 0.0)) and bool(jnp.all(std2 == STD))

    # Note: the PyTorch module returns plain (mean, std) tensors; any downstream
    # distribution object (e.g. torchd.Normal) is built outside this module.
    print("KERNEL_OK")
</pallas_src>

<mosaic_0001>
module attributes {stable_mosaic.version = 11 : i64} {
  func.func @fixed_gaussian_kernel(%arg0: i32, %arg1: memref<1xf32, #tpu.memory_space<smem>>, %arg2: memref<8x6xf32, #tpu.memory_space<vmem>>, %arg3: memref<8x6xf32, #tpu.memory_space<vmem>>) attributes {dimension_semantics = [#tpu.dimension_semantics<parallel>], iteration_bounds = array<i64: 1>, scalar_prefetch = 0 : i64, scratch_operands = 0 : i64, tpu.core_type = #tpu.core_type<tc>, window_params = [{transform_indices = @transform_0, window_bounds = array<i64: 1>}, {transform_indices = @transform_1, window_bounds = array<i64: 8, 6>}, {transform_indices = @transform_2, window_bounds = array<i64: 8, 6>}]} {
    %cst = arith.constant 0.000000e+00 : f32
    %0 = vector.broadcast %cst : f32 to vector<8x6xf32>
    %c0 = arith.constant 0 : index
    %c0_0 = arith.constant 0 : index
    %1 = vector.load %arg2[%c0, %c0_0] : memref<8x6xf32, #tpu.memory_space<vmem>>, vector<8x6xf32>
    tpu.vector_store %arg2[%c0, %c0_0], %0 {strides = array<i32>} : memref<8x6xf32, #tpu.memory_space<vmem>>, vector<8x6xf32>,
    %c0_1 = arith.constant 0 : index
    %2 = memref.load %arg1[%c0_1] : memref<1xf32, #tpu.memory_space<smem>>
    %3 = vector.broadcast %2 : f32 to vector<8x6xf32>
    %c0_2 = arith.constant 0 : index
    %c0_3 = arith.constant 0 : index
    %4 = vector.load %arg3[%c0_2, %c0_3] : memref<8x6xf32, #tpu.memory_space<vmem>>, vector<8x6xf32>
    tpu.vector_store %arg3[%c0_2, %c0_3], %3 {strides = array<i32>} : memref<8x6xf32, #tpu.memory_space<vmem>>, vector<8x6xf32>,
    return
  }
  func.func @transform_0(%arg0: i32) -> i32 {
    %c0_i32 = arith.constant 0 : i32
    %c0_i32_0 = arith.constant 0 : i32
    return %c0_i32 : i32
  }
  func.func @transform_1(%arg0: i32) -> (i32, i32) {
    %c0_i32 = arith.constant 0 : i32
    %c0_i32_0 = arith.constant 0 : i32
    return %arg0, %c0_i32 : i32, i32
  }
  func.func @transform_2(%arg0: i32) -> (i32, i32) {
    %c0_i32 = arith.constant 0 : i32
    %c0_i32_0 = arith.constant 0 : i32
    return %arg0, %c0_i32 : i32, i32
  }
}

</mosaic_0001>

<bundles_post_ra>
// kernel: tpu_custom_call.1
= control target key start
LH: loop header
LB: loop body
LE: loop exit
PB: predicated region body
PF: predicated region fallthrough
CT: control target
= control target key end

     0   :  { %9 = vsyncpa [#allocation4], 0  ;;  %vm13_vm0 = vcmask 48128   ;;  %s142_s0 = inlined_call_operand.<no memory space> [shape: f32[1], index: 0, kind: input, shape index: {}]   ;;  %s143_s1 = inlined_call_operand.hbm [shape: f32[8,6], index: 1, kind: output, shape index: {0}]   ;;  %s144_s2 = inlined_call_operand.hbm [shape: f32[8,6], index: 2, kind: output, shape index: {1}]  }
   0x1   :  { %v16_v0 = vstv %s142_s0 }
   0x2   :  { %10 = vsyncpa [#allocation6], 0  ;;  %v97_v1 = vmov 0.0   ;;  %17 = vst.msk [vmem:[#allocation5] sm:$0xff] %vm13_vm0, %v16_v0  ;;  %s98_s11 = smov [#allocation3]   ;;  %s99_s13 = smov [#allocation5]  }
   0x3   :  { %14 = vst.msk [vmem:[#allocation3] sm:$0xff] %vm13_vm0, %v97_v1  ;;  %s24_s12 = sshll.u32 %s98_s11, 4  ;;  %s34_s14 = sshll.u32 %s99_s13, 4  ;;  %s25_s12 = int_to_ptr.vmem [resolvable:$true] %s24_s12  ;;  %s35_s14 = int_to_ptr.vmem [resolvable:$true] %s34_s14 }
   0x4   :  { %s49_s15 = scalar_lea.vmem %s25_s12, 128  ;;  %p54_p1 = scmp.lt.s32.totalorder %s25_s12, %s25_s12 }
   0x5   :  { %p50_p0 = scmp.ne.s32.totalorder %s25_s12, %s49_s15  ;;  %p55_p2 = scmp.lt.s32.totalorder %s49_s15, %s49_s15 }
   0x7   :  { %p56_p3 = por %p55_p2, %p54_p1 }
   0x9   :  { %p57_p4 = pnand %p56_p3, %p50_p0 }
   0xb   :  { %60 = shalt.err (!%p57_p4)
}
   0xc   :  { %s61_s0 = scalar_lea.hbm %s143_s1, 128 }
   0xd   :  { %p62_p5 = scmp.ne.s32.totalorder %s143_s1, %s61_s0  ;;  %p65_p6 = scmp.lt.u32.totalorder %s61_s0, %s143_s1 }
   0xf   :  { %p67_p7 = pnand %p65_p6, %p62_p5 }
  0x11   :  { %70 = shalt.err (!%p67_p7)
}
  0x12   :  { %27 = dma.vmem_to_hbm [thread:$0]  %s25_s12, 128, %s143_s1, [#allocation4]  }
  0x13   :  { %s71_s24 = scalar_lea.vmem %s35_s14, 128  ;;  %p76_p9 = scmp.lt.s32.totalorder %s35_s14, %s35_s14 }
  0x14   :  { %p72_p8 = scmp.ne.s32.totalorder %s35_s14, %s71_s24  ;;  %p77_p10 = scmp.lt.s32.totalorder %s71_s24, %s71_s24 }
  0x16   :  { %p78_p11 = por %p77_p10, %p76_p9 }
  0x18   :  { %p79_p12 = pnand %p78_p11, %p72_p8 }
  0x1a   :  { %82 = shalt.err (!%p79_p12)
}
  0x1b   :  { %s83_s27 = scalar_lea.hbm %s144_s2, 128 }
  0x1c   :  { %p84_p13 = scmp.ne.s32.totalorder %s144_s2, %s83_s27  ;;  %p87_p0 = scmp.lt.u32.totalorder %s83_s27, %s144_s2 }
  0x1e   :  { %p89_p1 = pnand %p87_p0, %p84_p13 }
  0x20   :  { %92 = shalt.err (!%p89_p1)
}
  0x21   :  { %37 = dma.vmem_to_hbm [thread:$0]  %s35_s14, 128, %s144_s2, [#allocation6]  }
  0x22   :  { %93 = dma.done.wait [#allocation4], 128  }
  0x23   :  { %94 = vsyncadd [#allocation4], 4294967168 }
  0x24   :  { %95 = dma.done.wait [#allocation6], 128  }
  0x25   :  { %96 = vsyncadd [#allocation6], 4294967168 }
  0x26   :  { %44 = vsyncpa [#allocation4], 1 }
  0x27   :  { %45 = vsyncpa [#allocation6], 1 }

</bundles_post_ra>
